<compile_context>
chip_gen: v7x
topology: tpu7x:2x2x1
jax: 0.10.0
libtpu: 0.0.40
codegen_flags: <defaults>
</compile_context>

<pallas_src>
import math
from functools import partial

import numpy as np
import jax
import jax.numpy as jnp
from jax import lax
from jax.experimental import pallas as pl
from jax.experimental.pallas import tpu as pltpu


def _round_up(x, m):
    return ((x + m - 1) // m) * m


def _patch_matmul_bias_relu_kernel(x_ref, w_ref, b_ref, o_ref):
    """o = relu(x @ w + b) for one (TM, K') tile of packed im2col rows.

    x_ref: (TM, K')        bf16 packed patches, K' = g * s^3 * Cin
    w_ref: (K', lane_w)    bf16 block-diagonal weights, resident across the grid
    b_ref: (1, lane_w)     f32 tiled bias
    o_ref: (TM, lane_w)    out_dtype (bf16 by default), lane-dense
    """
    acc = jnp.dot(x_ref[...], w_ref[...], preferred_element_type=jnp.float32)
    acc = acc + b_ref[...]                       # f32 elementwise tail (v5e-safe)
    o_ref[...] = jnp.maximum(acc, 0.0).astype(o_ref.dtype)


def _vmem_budget_and_limit():
    """Per-generation VMEM budget for tiling and the scoped-VMEM limit."""
    phys = 0
    try:
        info = pltpu.get_tpu_info()
        phys = int(getattr(info, "vmem_capacity_bytes", 0) or 0)
    except Exception:
        phys = 0
    if phys > 0:
        budget = min((phys * 3) // 8, 48 * 1024 * 1024)   # ~24 MiB on v7x, 48 MiB on v5e/v6e
        limit = min(phys // 2, 64 * 1024 * 1024)          # 32 MiB on v7x, 64 MiB on v5e/v6e
        return budget, max(limit, budget)
    # Conservative fallback that works on every generation.
    return 24 * 1024 * 1024, 32 * 1024 * 1024


def _choose_tm(k_packed, lane_w, out_bytes, n_rows, budget):
    """Largest row tile whose double-buffered blocks (minus resident weights)
    fit the budget, then shrunk so the 1-D grid has >= 2 steps (v7x megacore)."""
    resident = 2 * (k_packed * lane_w * 2) + 2 * (lane_w * 4)   # weights + bias buffers
    avail = max(budget - resident, 2 * 1024 * 1024)
    per_row = 2 * (k_packed * 2) + 2 * (lane_w * out_bytes)     # 2x-buffered bf16 in + out
    tm = 2048
    while tm > 8 and tm * per_row > avail:
        tm //= 2
    if n_rows >= 16:                                            # keep grid >= 2
        tm = min(tm, _round_up(-(-n_rows // 2), 8))
    return max(8, min(tm, _round_up(n_rows, 8)))


@partial(jax.jit, static_argnames=("stride", "channels_last", "out_dtype"))
def downsampling_conv_block_forward(x, w_pt, b, *, stride=2, channels_last=False,
                                    out_dtype=jnp.bfloat16):
    """DownsamplingConvBlock forward.

    channels_last=False: x is NCDHW, output is NCDHW (PyTorch semantics).
    channels_last=True : x is NDHWC, output is NDHWC (no layout round trips).
    """
    s = int(stride)
    Cout, Cin = int(w_pt.shape[0]), int(w_pt.shape[1])
    if channels_last:
        N, D, H, W, _ = x.shape
    else:
        N, _, D, H, W = x.shape
    Do, Ho, Wo = D // s, H // s, W // s
    K = s * s * s * Cin
    M = N * Do * Ho * Wo

    # --- output lane-packing factor: pack g voxels per 128-lane output row.
    if Cout % 128 == 0:
        g, lane_w = 1, Cout
    elif 128 % Cout == 0:
        g, lane_w = 128 // Cout, 128
    else:
        g, lane_w = 1, _round_up(Cout, 128)      # general fallback (some padding)
    Kp = g * K

    # --- im2col / patchify: one XLA transpose (no halo, no padding: k == stride).
    if channels_last:
        xt = x[:, :Do * s, :Ho * s, :Wo * s, :]
        xt = xt.reshape(N, Do, s, Ho, s, Wo, s, Cin)
        xt = jnp.transpose(xt, (0, 1, 3, 5, 2, 4, 6, 7))   # (N,Do,Ho,Wo,kd,kh,kw,Cin)
    else:
        xt = x[:, :, :Do * s, :Ho * s, :Wo * s]
        xt = xt.reshape(N, Cin, Do, s, Ho, s, Wo, s)
        xt = jnp.transpose(xt, (0, 2, 4, 6, 3, 5, 7, 1))   # (N,Do,Ho,Wo,kd,kh,kw,Cin)
    patches = xt.reshape(M, K).astype(jnp.bfloat16)

    # pack g consecutive voxels per row: (M, K) -> (Mg, g*K)
    Mg = -(-M // g)
    if Mg * g != M:
        patches = jnp.pad(patches, ((0, Mg * g - M), (0, 0)))
    patches = patches.reshape(Mg, Kp)

    # --- weights: (Cout, Cin, kd, kh, kw) -> block-diagonal (g*K, g*Cout), lane-padded.
    wk = jnp.transpose(w_pt, (2, 3, 4, 1, 0)).reshape(K, Cout)
    wk = jnp.kron(jnp.eye(g, dtype=wk.dtype), wk)                       # (g*K, g*Cout)
    wk = jnp.pad(wk, ((0, 0), (0, lane_w - g * Cout))).astype(jnp.bfloat16)
    bk = jnp.pad(jnp.tile(b.astype(jnp.float32), g),
                 (0, lane_w - g * Cout)).reshape(1, lane_w)

    # --- tiling against a per-generation VMEM budget.
    out_bytes = jnp.dtype(out_dtype).itemsize
    budget, vmem_limit = _vmem_budget_and_limit()
    tm = _choose_tm(Kp, lane_w, out_bytes, Mg, budget)
    Mg_pad = _round_up(Mg, tm)
    if Mg_pad != Mg:
        patches = jnp.pad(patches, ((0, Mg_pad - Mg), (0, 0)))

    grid = (Mg_pad // tm,)
    cost = pl.CostEstimate(
        flops=2 * Mg_pad * Kp * lane_w,
        transcendentals=0,
        bytes_accessed=(Mg_pad * Kp * 2 + Kp * lane_w * 2 + lane_w * 4
                        + Mg_pad * lane_w * out_bytes))

    out = pl.pallas_call(
        _patch_matmul_bias_relu_kernel,
        out_shape=jax.ShapeDtypeStruct((Mg_pad, lane_w), out_dtype),
        grid_spec=pltpu.PrefetchScalarGridSpec(
            num_scalar_prefetch=0,
            grid=grid,
            in_specs=[
                # packed patches tile (double-buffered by the pipeline)
                pl.BlockSpec((tm, Kp), lambda i: (i, 0)),
                # resident weights/bias (constant index_map).  Note: could be
                # pipeline_mode=pl.Buffered(1); after packing they are only a
                # few hundred KiB so the extra buffer is negligible.
                pl.BlockSpec((Kp, lane_w), lambda i: (0, 0)),
                pl.BlockSpec((1, lane_w), lambda i: (0, 0)),
            ],
            out_specs=pl.BlockSpec((tm, lane_w), lambda i: (i, 0)),
        ),
        compiler_params=pltpu.CompilerParams(
            dimension_semantics=("parallel",),
            vmem_limit_bytes=vmem_limit),
        cost_estimate=cost,
    )(patches, wk, bk)

    # unpack lanes: (Mg_pad, lane_w) -> (M, Cout) -> NDHWC
    y = out[:Mg, :g * Cout].reshape(Mg * g, Cout)[:M]
    y = y.reshape(N, Do, Ho, Wo, Cout)
    if channels_last:
        return y
    return jnp.transpose(y, (0, 4, 1, 2, 3))                   # NDHWC -> NCDHW


def init_downsampling_params(key, n_filters_in, n_filters_out, stride=2):
    """PyTorch Conv3d default init: U(-1/sqrt(fan_in), 1/sqrt(fan_in))."""
    k = stride
    fan_in = n_filters_in * k * k * k
    bound = 1.0 / math.sqrt(fan_in)
    wkey, bkey = jax.random.split(key)
    w_pt = jax.random.uniform(wkey, (n_filters_out, n_filters_in, k, k, k),
                              jnp.float32, -bound, bound)
    b = jax.random.uniform(bkey, (n_filters_out,), jnp.float32, -bound, bound)
    return w_pt, b


def downsampling_reference(x_ncdhw, w_pt, b, stride=2):
    """Pure-JAX reference (PyTorch semantics): strided VALID conv + bias + ReLU."""
    s = stride
    y = lax.conv_general_dilated(
        x_ncdhw, w_pt, window_strides=(s, s, s), padding='VALID',
        dimension_numbers=('NCDHW', 'OIDHW', 'NCDHW'))
    y = y + b.reshape(1, -1, 1, 1, 1)
    return jnp.maximum(y, 0.0)


if __name__ == "__main__":
    # DownsamplingConvBlock(n_filters_in=4, n_filters_out=8, stride=2)
    n_filters_in, n_filters_out, stride = 4, 8, 2
    N, D, H, W = 2, 16, 16, 16

    key = jax.random.PRNGKey(0)
    key, xkey = jax.random.split(key)
    x = jax.random.normal(xkey, (N, n_filters_in, D, H, W), jnp.float32)
    w_pt, b = init_downsampling_params(key, n_filters_in, n_filters_out, stride)

    # Pre-round activations/weights to bf16 so the bf16-MXU kernel and the f32
    # reference see identical input values (both accumulate in f32; the kernel
    # output is additionally bf16-rounded, covered by the tolerance below).
    x = x.astype(jnp.bfloat16).astype(jnp.float32)
    w_pt = w_pt.astype(jnp.bfloat16).astype(jnp.float32)

    ref = jax.block_until_ready(downsampling_reference(x, w_pt, b, stride=stride))

    # PyTorch-layout (NCDHW) path.
    out = downsampling_conv_block_forward(x, w_pt, b, stride=stride)
    out = jax.block_until_ready(out)
    assert out.shape == (N, n_filters_out, D // stride, H // stride, W // stride)
    np.testing.assert_allclose(np.asarray(out.astype(jnp.float32)),
                               np.asarray(ref), rtol=2e-2, atol=2e-2)

    # Channels-last (NDHWC) path — skips both layout round trips around the kernel.
    x_cl = jnp.transpose(x, (0, 2, 3, 4, 1))
    out_cl = downsampling_conv_block_forward(x_cl, w_pt, b, stride=stride,
                                             channels_last=True)
    out_cl = jax.block_until_ready(out_cl)
    ref_cl = jnp.transpose(ref, (0, 2, 3, 4, 1))
    np.testing.assert_allclose(np.asarray(out_cl.astype(jnp.float32)),
                               np.asarray(ref_cl), rtol=2e-2, atol=2e-2)

    print("KERNEL_OK")
</pallas_src>

<mosaic_0001>
module attributes {stable_mosaic.version = 11 : i64} {
  func.func @_patch_matmul_bias_relu_kernel(%arg0: i32, %arg1: memref<32x512xbf16, #tpu.memory_space<vmem>>, %arg2: memref<512x128xbf16, #tpu.memory_space<vmem>>, %arg3: memref<1x128xf32, #tpu.memory_space<vmem>>, %arg4: memref<32x128xbf16, #tpu.memory_space<vmem>>) attributes {dimension_semantics = [#tpu.dimension_semantics<parallel>], iteration_bounds = array<i64: 2>, scalar_prefetch = 0 : i64, scratch_operands = 0 : i64, tpu.core_type = #tpu.core_type<tc>, window_params = [{transform_indices = @transform_0, window_bounds = array<i64: 32, 512>}, {pipeline_mode = #tpu.pipeline_mode<synchronous>, transform_indices = @transform_1, window_bounds = array<i64: 512, 128>}, {pipeline_mode = #tpu.pipeline_mode<synchronous>, transform_indices = @transform_2, window_bounds = array<i64: 1, 128>}, {transform_indices = @transform_3, window_bounds = array<i64: 32, 128>}]} {
    %c0 = arith.constant 0 : index
    %c0_0 = arith.constant 0 : index
    %0 = vector.load %arg1[%c0, %c0_0] : memref<32x512xbf16, #tpu.memory_space<vmem>>, vector<32x512xbf16>
    %c0_1 = arith.constant 0 : index
    %c0_2 = arith.constant 0 : index
    %1 = vector.load %arg2[%c0_1, %c0_2] : memref<512x128xbf16, #tpu.memory_space<vmem>>, vector<512x128xbf16>
    %cst = arith.constant dense<0.000000e+00> : vector<32x128xf32>
    %2 = tpu.matmul %0, %1, %cst {dimension_numbers = #tpu.dot_dimension_numbers<[1], [0], [0], [1], [0, 0, 1, 1], [], []>} : vector<32x512xbf16>, vector<512x128xbf16>, vector<32x128xf32> -> vector<32x128xf32>
    %c0_3 = arith.constant 0 : index
    %c0_4 = arith.constant 0 : index
    %3 = vector.load %arg3[%c0_3, %c0_4] : memref<1x128xf32, #tpu.memory_space<vmem>>, vector<1x128xf32>
    %4 = vector.broadcast %3 : vector<1x128xf32> to vector<32x128xf32>
    %5 = arith.addf %2, %4 : vector<32x128xf32>
    %cst_5 = arith.constant 0.000000e+00 : f32
    %6 = vector.broadcast %cst_5 : f32 to vector<32x128xf32>
    %7 = arith.maximumf %5, %6 : vector<32x128xf32>
    %8 = arith.truncf %7 : vector<32x128xf32> to vector<32x128xbf16>
    %c0_6 = arith.constant 0 : index
    %c0_7 = arith.constant 0 : index
    %9 = vector.load %arg4[%c0_6, %c0_7] : memref<32x128xbf16, #tpu.memory_space<vmem>>, vector<32x128xbf16>
    tpu.vector_store %arg4[%c0_6, %c0_7], %8 {strides = array<i32>} : memref<32x128xbf16, #tpu.memory_space<vmem>>, vector<32x128xbf16>,
    return
  }
  func.func @transform_0(%arg0: i32) -> (i32, i32) {
    %c0_i32 = arith.constant 0 : i32
    %c0_i32_0 = arith.constant 0 : i32
    return %arg0, %c0_i32 : i32, i32
  }
  func.func @transform_1(%arg0: i32) -> (i32, i32) {
    %c0_i32 = arith.constant 0 : i32
    %c0_i32_0 = arith.constant 0 : i32
    %c0_i32_1 = arith.constant 0 : i32
    return %c0_i32, %c0_i32_0 : i32, i32
  }
  func.func @transform_2(%arg0: i32) -> (i32, i32) {
    %c0_i32 = arith.constant 0 : i32
    %c0_i32_0 = arith.constant 0 : i32
    %c0_i32_1 = arith.constant 0 : i32
    return %c0_i32, %c0_i32_0 : i32, i32
  }
  func.func @transform_3(%arg0: i32) -> (i32, i32) {
    %c0_i32 = arith.constant 0 : i32
    %c0_i32_0 = arith.constant 0 : i32
    return %arg0, %c0_i32 : i32, i32
  }
}

</mosaic_0001>

<bundles_post_ra>
// kernel: tile.8
= control target key start
LH: loop header
LB: loop body
LE: loop exit
PB: predicated region body
PF: predicated region fallthrough
CT: control target
= control target key end

     0   :  { %s28_s0 = inlined_call_operand.vmem [shape: f32[8], index: 0, kind: input, shape index: {}]   ;;  %s29_s1 = inlined_call_operand.vmem [shape: f32[16,8], index: 1, kind: output, shape index: {}]  }
   0x1   :  { %v4_v0 = vld [vmem:[%s28_s0] ss:$0 sm:$0xff] }
   0x2   :  { %5 = vst [vmem:[%s29_s1] sm:$0xff] %v4_v0  ;;  %8 = vst [vmem:[%s29_s1 + $0x8] sm:$0xff] %v4_v0 }

// kernel: downsampling_conv_block_forward.1
= control target key start
LH: loop header
LB: loop body
LE: loop exit
PB: predicated region body
PF: predicated region fallthrough
CT: control target
= control target key end

     0   :  { %s876_s12 = smov 0   ;;  %s998_s0 = inlined_call_operand.vmem [shape: bf16[64,512], index: 0, kind: input, shape index: {}]   ;;  %s999_s1 = inlined_call_operand.vmem [shape: bf16[512,128], index: 1, kind: input, shape index: {}]   ;;  %s1000_s2 = inlined_call_operand.vmem [shape: f32[1,128], index: 2, kind: input, shape index: {}]   ;;  %s1001_s3 = inlined_call_operand.vmem [shape: bf16[64,128], index: 3, kind: output, shape index: {}]  }
   0x1 LB: > { %s667_s13 = sadd.s32 4294967295, %s854_s12   ;;  %p671_p0 = scmp.ge.s32.totalorder %s854_s12, 1  ;;  %s854_s12 = sphi %s876_s12, %s13_s12  }
   0x2   : > { %p139_p1 = scmp.lt.s32.totalorder %s854_s12, 3 }
   0x4   : > { %p140_p2 = pnand %p671_p0, %p139_p1 }
   0x5   : > { %v804_v0 = vld [vmem:[%s999_s1 + $0x40] sm:$0xff] (!%p140_p2)   ;;  %v808_v4 = vld [vmem:[%s999_s1 + $0x48] sm:$0xff] (!%p140_p2)   ;;  %v812_v8 = vld [vmem:[%s999_s1 + $0x50] sm:$0xff] (!%p140_p2)   ;;  %s672_s21 = sshll.u32 (!%p140_p2), %s667_s13, 2 }
   0x6   : > { %143 = sbr.rel (%p140_p2) target bundleno = 273 (0x111), region = 32  ;;  %v805_v1 = vld [vmem:[%s999_s1 + $0xc0] sm:$0xff] (!%p140_p2)   ;;  %740 = vmatprep.subr.bf16.mxu0 (!%p140_p2), %v804_v0  ;;  %v809_v5 = vld [vmem:[%s999_s1 + $0xc8] sm:$0xff] (!%p140_p2)   ;;  %v813_v9 = vld [vmem:[%s999_s1 + $0xd0] sm:$0xff] (!%p140_p2)   ;;  %p165_p3 = scmp.lt.s32.totalorder (!%p140_p2), %s672_s21, 7 }
   0x7   : > { %v806_v2 = vld [vmem:[%s999_s1] sm:$0xff] (!%p140_p2)   ;;  %768 = vmatprep.subr.bf16.mxu1 (!%p140_p2), %v805_v1  ;;  %v810_v6 = vld [vmem:[%s999_s1 + $0x8] sm:$0xff] (!%p140_p2)   ;;  %v814_v10 = vld [vmem:[%s999_s1 + $0x10] sm:$0xff] (!%p140_p2)  }
   0x8   : > { %v807_v3 = vld [vmem:[%s999_s1 + $0x80] sm:$0xff] (!%p140_p2)   ;;  %741 = vmatpush3.bf16.msra.mxu0 (!%p140_p2), %v806_v2  ;;  %v811_v7 = vld [vmem:[%s999_s1 + $0x88] sm:$0xff] (!%p140_p2)   ;;  %v815_v11 = vld [vmem:[%s999_s1 + $0x90] sm:$0xff] (!%p140_p2)  }
   0x9   : > { %769 = vmatpush3.bf16.msra.mxu1 (!%p140_p2), %v807_v3  ;;  %742 = vmatprep.subr.bf16.mxu0 (!%p140_p2), %v808_v4  ;;  %v816_v12 = vld [vmem:[%s999_s1 + $0x58] sm:$0xff] (!%p140_p2)   ;;  %v820_v16 = vld [vmem:[%s999_s1 + $0x60] sm:$0xff] (!%p140_p2)   ;;  %v824_v20 = vld [vmem:[%s999_s1 + $0x68] sm:$0xff] (!%p140_p2)  }
   0xa   : > { %770 = vmatprep.subr.bf16.mxu1 (!%p140_p2), %v809_v5  ;;  %v817_v13 = vld [vmem:[%s999_s1 + $0xd8] sm:$0xff] (!%p140_p2)   ;;  %v821_v17 = vld [vmem:[%s999_s1 + $0xe0] sm:$0xff] (!%p140_p2)   ;;  %v825_v21 = vld [vmem:[%s999_s1 + $0xe8] sm:$0xff] (!%p140_p2)  }
   0xb   : > { %v818_v14 = vld [vmem:[%s999_s1 + $0x18] sm:$0xff] (!%p140_p2)   ;;  %v822_v18 = vld [vmem:[%s999_s1 + $0x20] sm:$0xff] (!%p140_p2)   ;;  %v826_v22 = vld [vmem:[%s999_s1 + $0x28] sm:$0xff] (!%p140_p2)  }
   0xc   : > { %743 = vmatpush3.bf16.msra.mxu0 (!%p140_p2), %v810_v6  ;;  %v819_v15 = vld [vmem:[%s999_s1 + $0x98] sm:$0xff] (!%p140_p2)   ;;  %v823_v19 = vld [vmem:[%s999_s1 + $0xa0] sm:$0xff] (!%p140_p2)   ;;  %v827_v23 = vld [vmem:[%s999_s1 + $0xa8] sm:$0xff] (!%p140_p2)  }
   0xd   : > { %771 = vmatpush3.bf16.msra.mxu1 %v811_v7  ;;  %744 = vmatprep.subr.bf16.mxu0 %v812_v8  ;;  %s1003_s21 = smov (!%p165_p3, %s672_s21), 7  ;;  %v828_v24 = vld [vmem:[%s999_s1 + $0x70] sm:$0xff]   ;;  %v832_v28 = vld [vmem:[%s999_s1 + $0x78] sm:$0xff]   ;;  %v677_v42 = vld [vmem:[%s1000_s2] ss:$0 sm:$0xff] }
   0xe   : > { %772 = vmatprep.subr.bf16.mxu1 %v813_v9  ;;  %v829_v25 = vld [vmem:[%s999_s1 + $0xf0] sm:$0xff]   ;;  %s724_s18 = sshll.u32 %s1003_s21, 4  ;;  %v833_v29 = vld [vmem:[%s999_s1 + $0xf8] sm:$0xff]   ;;  %s676_s7 = sshll.u32 %s1003_s21, 2 }
   0xf   : > { %v830_v26 = vld [vmem:[%s999_s1 + $0x30] sm:$0xff]   ;;  %s169_s28 = scalar_lea.vmem %s998_s0, %s724_s18  ;;  %v834_v30 = vld [vmem:[%s999_s1 + $0x38] sm:$0xff]   ;;  %s175_s10 = scalar_lea.vmem %s1001_s3, %s676_s7 }
  0x10   : > { %745 = vmatpush3.bf16.msra.mxu0 %v814_v10  ;;  %v831_v27 = vld [vmem:[%s999_s1 + $0xb0] sm:$0xff]   ;;  %v835_v31 = vld [vmem:[%s999_s1 + $0xb8] sm:$0xff]  }
  0x11   : > { %773 = vmatpush3.bf16.msra.mxu1 %v815_v11  ;;  %746 = vmatprep.subr.bf16.mxu0 %v816_v12  ;;  %v836_v32 = vld [vmem:[%s169_s28] ss:$16 sps:$4 sm:$0xff]   ;;  %v838_v33 = vld [vmem:[%s169_s28 + $0x4] ss:$16 sps:$4 sm:$0xff]   ;;  %v839_v34 = vld [vmem:[%s169_s28 + $0x8] ss:$16 sps:$4 sm:$0xff]  }
  0x12   : > { %774 = vmatprep.subr.bf16.mxu1 %v817_v13  ;;  %v841_v35 = vld [vmem:[%s169_s28 + $0xc] ss:$16 sps:$4 sm:$0xff]   ;;  %521 = vmatprep.mubr.bf16.mxu0 %v838_v33  ;;  %v842_v36 = vld [vmem:[%s169_s28 + $0x24] ss:$16 sps:$4 sm:$0xff]   ;;  %v846_v38 = vld [vmem:[%s169_s28 + $0x20] ss:$16 sps:$4 sm:$0xff]  }
  0x13   : > { %570 = vmatprep.mubr.bf16.mxu1 %v841_v35  ;;  %v844_v37 = vld [vmem:[%s169_s28 + $0x2c] ss:$16 sps:$4 sm:$0xff]   ;;  %v847_v39 = vld [vmem:[%s169_s28 + $0x28] ss:$16 sps:$4 sm:$0xff]  }
  0x14   : > { %747 = vmatpush3.bf16.msra.mxu0 %v818_v14 }
  0x15   : > { %775 = vmatpush3.bf16.msra.mxu1 %v819_v15  ;;  %748 = vmatprep.subr.bf16.mxu0 %v820_v16 }
  0x16   : > { %776 = vmatprep.subr.bf16.mxu1 %v821_v17 }
  0x18   : > { %749 = vmatpush3.bf16.msra.mxu0 %v822_v18 }
  0x19   : > { %777 = vmatpush3.bf16.msra.mxu1 %v823_v19  ;;  %750 = vmatprep.subr.bf16.mxu0 %v824_v20 }
  0x1a   : > { %778 = vmatprep.subr.bf16.mxu1 %v825_v21 }
  0x1c   : > { %751 = vmatpush3.bf16.msra.mxu0 %v826_v22 }
  0x1d   : > { %779 = vmatpush3.bf16.msra.mxu1 %v827_v23  ;;  %752 = vmatprep.subr.bf16.mxu0 %v828_v24 }
  0x1e   : > { %780 = vmatprep.subr.bf16.mxu1 %v829_v25 }
  0x20   : > { %753 = vmatpush3.bf16.msra.mxu0 %v830_v26 }
  0x21   : > { %781 = vmatpush3.bf16.msra.mxu1 %v831_v27  ;;  %754 = vmatprep.subr.bf16.mxu0 %v832_v28 }
  0x22   : > { %782 = vmatprep.subr.bf16.mxu1 %v833_v29 }
  0x24   : > { %755 = vmatpush3.bf16.msra.mxu0 %v834_v30 }
  0x25   : > { %783 = vmatpush3.bf16.msra.mxu1 %v835_v31 }
  0x27   : > { %522 = vmatmul.mubr.bf16.vlgmr.msra.gmra.mrb[0].mxu0 %v836_v32 }
  0x28   : > { %571 = vmatmul.mubr.bf16.vlgmr.msra.gmra.mrb[0].mxu1 %v839_v34  ;;  %529 = vmatprep.mubr.bf16.mxu0 %v842_v36 }
  0x29   : > { %578 = vmatprep.mubr.bf16.mxu1 %v844_v37 }
  0x2f   : > { %530 = vmatmul.mubr.bf16.gmra.mrb[4].mxu0 %v846_v38 }
  0x30   : > { %579 = vmatmul.mubr.bf16.gmra.mrb[4].mxu1 %v847_v39 }
  0xfa   : > { %v756_v40 = vpop.f32.mrb[0].mxu0 }
  0xfb   : > { %v784_v41 = vpop.f32.mrb[0].mxu1  ;;  %v757_v43 = vpop.f32.mrb[1].mxu0 }
  0xfc   : > { %v758_v44 = vadd.f32 %v757_v43, %v756_v40  ;;  %v785_v45 = vpop.f32.mrb[1].mxu1  ;;  %v759_v46 = vpop.f32.mrb[2].mxu0 }
  0xfd   : > { %v786_v47 = vadd.f32 %v785_v45, %v784_v41  ;;  %v787_v48 = vpop.f32.mrb[2].mxu1  ;;  %v760_v49 = vpop.f32.mrb[3].mxu0 }
  0xfe   : > { %v524_v50 = vadd.f32 %v758_v44, %v677_v42  ;;  %v761_v51 = vadd.f32 %v760_v49, %v759_v46  ;;  %v788_v52 = vpop.f32.mrb[3].mxu1 }
  0xff   : > { %v789_v53 = vadd.f32 %v788_v52, %v787_v48 }
 0x100   : > { %v573_v54 = vadd.f32 %v786_v47, %v524_v50  ;;  %v527_v55 = vadd.f32 %v761_v51, %v677_v42 }
 0x102   : > { %v576_v56 = vadd.f32 %v789_v53, %v527_v55  ;;  %v762_v57 = vpop.f32.mrb[4].mxu0  ;;  %v587_v60 = vmax.f32 %v573_v54, 0.0 }
 0x103   : > { %v790_v58 = vpop.f32.mrb[4].mxu1  ;;  %v763_v59 = vpop.f32.mrb[5].mxu0 }
 0x104   : > { %v588_v61 = vmax.f32 %v576_v56, 0.0  ;;  %v764_v62 = vadd.f32 %v763_v59, %v762_v57  ;;  %v791_v63 = vpop.f32.mrb[5].mxu1  ;;  %v765_v0 = vpop.f32.mrb[6].mxu0 }
 0x105   : > { %v792_v1 = vadd.f32 %v791_v63, %v790_v58  ;;  %v793_v2 = vpop.f32.mrb[6].mxu1  ;;  %v766_v3 = vpop.f32.mrb[7].mxu0 }
 0x106   : > { %v732_v4 = vpack.c.bf16 %v588_v61, %v587_v60  ;;  %v532_v5 = vadd.f32 %v764_v62, %v677_v42  ;;  %v767_v6 = vadd.f32 %v766_v3, %v765_v0  ;;  %v794_v7 = vpop.f32.mrb[7].mxu1 }
 0x107   : > { %v795_v8 = vadd.f32 %v794_v7, %v793_v2 }
 0x108   : > { %733 = vst [vmem:[%s175_s10] sm:$0xff] %v732_v4   ;;  %v581_v9 = vadd.f32 %v792_v1, %v532_v5  ;;  %v535_v10 = vadd.f32 %v767_v6, %v677_v42 }
 0x10a   : > { %v584_v11 = vadd.f32 %v795_v8, %v535_v10  ;;  %v589_v12 = vmax.f32 %v581_v9, 0.0 }
 0x10c   : > { %v590_v13 = vmax.f32 %v584_v11, 0.0 }
 0x10e   : > { %v737_v14 = vpack.c.bf16 %v590_v13, %v589_v12 }
 0x110   : > { %739 = vst [vmem:[%s175_s10 + $0x8] sm:$0xff] %v737_v14  }
 0x111 PF: > { %s13_s12 = sadd.s32 1, %s854_s12  }
 0x112   : > { %p10_p4 = scmp.ge.s32.totalorder %s13_s12, 4  }
 0x114   :  { %12 = sbr.rel (!%p10_p4) target bundleno = 1 (0x1), region = 62 }

</bundles_post_ra>
